<compile_context>
chip_gen: v6e
topology: v6e:2x2x1
jax: 0.10.0
libtpu: 0.0.40
codegen_flags: <defaults>
</compile_context>

<pallas_src>
import functools

import jax
import jax.numpy as jnp
from jax.experimental import pallas as pl
from jax.experimental.pallas import tpu as pltpu

# ------------------------- "args" hyper-parameters -------------------------
VOCAB_SIZE  = 20
WORD_DIM    = 32          # args.word_dim
MAX_LEN     = 8           # args.max_len
FILTER_NUM  = 32          # args.filter_num
NUM_CLASSES = 4           # args.num_classes
IN_CHANNEL  = 1           # args.in_channel
BN_EPS      = 1e-5
BATCH       = 2
LANES       = 128         # lane-dense width for all kernel-side arrays

# The PyTorch module only type-checks when filter_num == word_dim (bn/fc sized by word_dim).
assert FILTER_NUM == WORD_DIM, "TextCNN_NLT requires filter_num == word_dim"


# ------------------------------- Pallas kernel ------------------------------
def textcnn_kernel(idx_ref, emb_ref, wc_ref, wfc_ref, slab_ref, out_ref, *, max_len):
    """Fused embed -> conv-as-matmul -> relu -> avgpool -> BN(eval) -> fc."""
    BL = idx_ref.shape[0]
    L = max_len
    B = BL // L
    V2 = emb_ref.shape[0]
    W = out_ref.shape[1]                           # 128: every store below is lane-dense

    # Packed small parameters: one DMA instead of six.
    slab = slab_ref[...]                           # (8, W)
    conv_b   = slab[0:1, :]                        # zeros beyond F
    bn_scale = slab[1:2, :]                        # gamma * rsqrt(var + eps)
    bn_shift = slab[2:3, :]                        # beta - mean * bn_scale
    fc_b     = slab[3:4, :]                        # zeros beyond C

    # --- Embedding lookup, fused in-kernel (exact one-hot select + sum) -------------
    idx3 = idx_ref[...].reshape(BL, 1, 1)                                  # int32
    viota = jax.lax.broadcasted_iota(jnp.int32, (BL, V2, W), 1)
    sel = jnp.where(viota == idx3, 1.0, 0.0)                               # (BL, V2, W)
    raw = jnp.sum(sel * emb_ref[...][None, :, :], axis=1)                  # (BL, W), zero beyond D

    # --- Conv1d(in=1, out=F, kernel=D, stride=D) over flattened embeddings ----------
    # == one linear projection per token (MXU) + bias, then ReLU.
    feat = jnp.dot(raw, wc_ref[...], preferred_element_type=jnp.float32) + conv_b
    feat = jnp.maximum(feat, 0.0)                                          # (BL, W), zero beyond F

    # --- avg_pool1d over the sequence (reshape only the reduction operand) ----------
    avg = jnp.mean(feat.reshape(B, L, W), axis=1)                          # (B, W)

    # --- BatchNorm1d eval folded to affine; dropout is identity in eval -------------
    bn = avg * bn_scale + bn_shift                                         # (B, W)

    # --- Classifier head (MXU) -------------------------------------------------------
    logits = jnp.dot(bn, wfc_ref[...], preferred_element_type=jnp.float32) + fc_b

    # --- single lane-dense output slab: one output DMA, unmasked 128-lane stores ----
    out_ref[0:BL, :]                          = raw      # raw_feature rows
    out_ref[BL:2 * BL, :]                     = feat     # x_feat.permute(0,2,1) rows
    out_ref[2 * BL:2 * BL + B, :]             = avg      # x_avg rows
    out_ref[2 * BL + B:2 * BL + 2 * B, :]     = bn       # x_avg_bn rows
    out_ref[2 * BL + 2 * B:2 * BL + 3 * B, :] = logits   # x_final rows


# ------------------------------- JAX wrapper --------------------------------
def _prep_params(p):
    """One-time parameter repack: pad weights to 128 lanes, fold BN, pack small rows."""
    D, F, C = WORD_DIM, FILTER_NUM, NUM_CLASSES
    V2 = p["embedding"].shape[0]
    emb_pad = jnp.zeros((V2, LANES), jnp.float32).at[:, :D].set(p["embedding"])
    wc_pad  = jnp.zeros((LANES, LANES), jnp.float32).at[:D, :F].set(p["conv_w"])
    wfc_pad = jnp.zeros((LANES, LANES), jnp.float32).at[:F, :C].set(p["fc_w"])
    bn_scale = p["bn_gamma"][0] * jax.lax.rsqrt(p["bn_var"][0] + BN_EPS)
    bn_shift = p["bn_beta"][0] - p["bn_mean"][0] * bn_scale
    slab = jnp.zeros((8, LANES), jnp.float32)
    slab = slab.at[0, :F].set(p["conv_b"][0])
    slab = slab.at[1, :F].set(bn_scale)
    slab = slab.at[2, :F].set(bn_shift)
    slab = slab.at[3, :C].set(p["fc_b"][0])
    return emb_pad, wc_pad, wfc_pad, slab


@jax.jit
def textcnn_forward(word_idx, params):
    B, L = word_idx.shape
    D, F, C = WORD_DIM, FILTER_NUM, NUM_CLASSES
    BL = B * L
    emb_pad, wc_pad, wfc_pad, slab = _prep_params(params)
    idx2d = word_idx.reshape(BL, 1).astype(jnp.int32)

    vspec = pl.BlockSpec(memory_space=pltpu.MemorySpace.VMEM)
    combined = pl.pallas_call(
        functools.partial(textcnn_kernel, max_len=L),
        out_shape=jax.ShapeDtypeStruct((2 * BL + 3 * B, LANES), jnp.float32),
        in_specs=[vspec] * 5,
        out_specs=vspec,
        # Single VMEM-resident call, no grid: at these shapes any grid/pipeline step
        # only adds fixed overhead with nothing to overlap.
        # TODO(synk): when BATCH/MAX_LEN scale up, add a batch grid with
        # dimension_semantics=("parallel",) (v7x 2-TC megacore) and size blocks
        # against v7x's 64 MiB VMEM via pltpu.CompilerParams(vmem_limit_bytes=...).
    )(idx2d, emb_pad, wc_pad, wfc_pad, slab)

    # Metadata-only slicing/reshaping back to the PyTorch return signature.
    raw_feature = combined[:BL, :D].reshape(B, L, D)
    x_feat_perm = combined[BL:2 * BL, :F].reshape(B, L, F)        # == x_feat.permute(0, 2, 1)
    x_avg       = combined[2 * BL:2 * BL + B, :F]
    x_avg_bn    = combined[2 * BL + B:2 * BL + 2 * B, :F]
    x_final     = combined[2 * BL + 2 * B:, :C]
    return x_final, x_avg_bn, x_avg, x_feat_perm, raw_feature


# --------------------------- deterministic params ---------------------------
def init_params(key):
    ks = jax.random.split(key, 9)
    emb = jax.random.normal(ks[0], (VOCAB_SIZE + 2, WORD_DIM), jnp.float32)
    emb = emb.at[VOCAB_SIZE + 1].set(0.0)                # padding_idx row is zero
    conv_w = 0.1 * jax.random.normal(ks[1], (WORD_DIM, FILTER_NUM), jnp.float32)
    conv_b = 0.1 * jax.random.normal(ks[2], (1, FILTER_NUM), jnp.float32)
    bn_gamma = 1.0 + 0.1 * jax.random.normal(ks[3], (1, FILTER_NUM), jnp.float32)
    bn_beta  = 0.1 * jax.random.normal(ks[4], (1, FILTER_NUM), jnp.float32)
    bn_mean  = 0.1 * jax.random.normal(ks[5], (1, FILTER_NUM), jnp.float32)
    bn_var   = jnp.abs(jax.random.normal(ks[6], (1, FILTER_NUM), jnp.float32)) + 0.5
    fc_w = 0.1 * jax.random.normal(ks[7], (FILTER_NUM, NUM_CLASSES), jnp.float32)
    fc_b = 0.1 * jax.random.normal(ks[8], (1, NUM_CLASSES), jnp.float32)
    return dict(embedding=emb, conv_w=conv_w, conv_b=conv_b,
                bn_gamma=bn_gamma, bn_beta=bn_beta, bn_mean=bn_mean, bn_var=bn_var,
                fc_w=fc_w, fc_b=fc_b)


# ------------------------ pure-JAX reference (check) -------------------------
def reference_forward(word_idx, p):
    raw = jnp.take(p["embedding"], word_idx, axis=0).astype(jnp.float32)   # (B, L, D)
    feat = jnp.maximum(jnp.einsum("bld,df->blf", raw, p["conv_w"]) + p["conv_b"][0], 0.0)
    avg = jnp.mean(feat, axis=1)
    bn = (avg - p["bn_mean"][0]) / jnp.sqrt(p["bn_var"][0] + BN_EPS) * p["bn_gamma"][0] + p["bn_beta"][0]
    out = bn @ p["fc_w"] + p["fc_b"][0]
    return out, bn, avg, feat, raw


if __name__ == "__main__":
    key = jax.random.PRNGKey(0)
    k_params, k_idx = jax.random.split(key)
    params = init_params(k_params)
    word_idx = jax.random.randint(k_idx, (BATCH, MAX_LEN), 0, VOCAB_SIZE + 2, dtype=jnp.int32)

    outs = textcnn_forward(word_idx, params)
    outs = jax.block_until_ready(outs)

    refs = reference_forward(word_idx, params)
    for o, r in zip(outs, refs):
        assert o.shape == r.shape, (o.shape, r.shape)
        assert jnp.allclose(o, r, atol=1e-4, rtol=1e-4)

    print("KERNEL_OK")
</pallas_src>

<mosaic_0001>
module attributes {stable_mosaic.version = 11 : i64} {
  func.func @textcnn_kernel(%arg0: memref<16x1xi32, #tpu.memory_space<vmem>>, %arg1: memref<22x128xf32, #tpu.memory_space<vmem>>, %arg2: memref<128x128xf32, #tpu.memory_space<vmem>>, %arg3: memref<128x128xf32, #tpu.memory_space<vmem>>, %arg4: memref<8x128xf32, #tpu.memory_space<vmem>>, %arg5: memref<38x128xf32, #tpu.memory_space<vmem>>) attributes {dimension_semantics = [], scalar_prefetch = 0 : i64, scratch_operands = 0 : i64, tpu.core_type = #tpu.core_type<tc>} {
    %c0 = arith.constant 0 : index
    %c0_0 = arith.constant 0 : index
    %0 = vector.load %arg4[%c0, %c0_0] : memref<8x128xf32, #tpu.memory_space<vmem>>, vector<8x128xf32>
    %1 = vector.extract_strided_slice %0 {offsets = [0, 0], sizes = [1, 128], strides = [1, 1]} : vector<8x128xf32> to vector<1x128xf32>
    %2 = vector.extract_strided_slice %0 {offsets = [1, 0], sizes = [1, 128], strides = [1, 1]} : vector<8x128xf32> to vector<1x128xf32>
    %3 = vector.extract_strided_slice %0 {offsets = [2, 0], sizes = [1, 128], strides = [1, 1]} : vector<8x128xf32> to vector<1x128xf32>
    %4 = vector.extract_strided_slice %0 {offsets = [3, 0], sizes = [1, 128], strides = [1, 1]} : vector<8x128xf32> to vector<1x128xf32>
    %c0_1 = arith.constant 0 : index
    %c0_2 = arith.constant 0 : index
    %5 = vector.load %arg0[%c0_1, %c0_2] : memref<16x1xi32, #tpu.memory_space<vmem>>, vector<16x1xi32>
    %6 = vector.shape_cast %5 : vector<16x1xi32> to vector<16x1x1xi32>
    %7 = tpu.iota {dimensions = array<i32: 1>} : vector<16x22x128xi32>
    %8 = vector.broadcast %6 : vector<16x1x1xi32> to vector<16x22x128xi32>
    %9 = arith.cmpi eq, %7, %8 : vector<16x22x128xi32>
    %cst = arith.constant 1.000000e+00 : f32
    %cst_3 = arith.constant 0.000000e+00 : f32
    %10 = vector.broadcast %cst : f32 to vector<16x22x128xf32>
    %11 = vector.broadcast %cst_3 : f32 to vector<16x22x128xf32>
    %12 = arith.select %9, %10, %11 : vector<16x22x128xi1>, vector<16x22x128xf32>
    %c0_4 = arith.constant 0 : index
    %c0_5 = arith.constant 0 : index
    %13 = vector.load %arg1[%c0_4, %c0_5] : memref<22x128xf32, #tpu.memory_space<vmem>>, vector<22x128xf32>
    %14 = vector.shape_cast %13 : vector<22x128xf32> to vector<1x22x128xf32>
    %15 = vector.broadcast %14 : vector<1x22x128xf32> to vector<16x22x128xf32>
    %16 = arith.mulf %12, %15 : vector<16x22x128xf32>
    %cst_6 = arith.constant dense<0.000000e+00> : vector<16x128xf32>
    %17 = vector.multi_reduction <add>, %16, %cst_6 [1] : vector<16x22x128xf32> to vector<16x128xf32>
    %c0_7 = arith.constant 0 : index
    %c0_8 = arith.constant 0 : index
    %18 = vector.load %arg2[%c0_7, %c0_8] : memref<128x128xf32, #tpu.memory_space<vmem>>, vector<128x128xf32>
    %cst_9 = arith.constant dense<0.000000e+00> : vector<16x128xf32>
    %19 = tpu.matmul %17, %18, %cst_9 {dimension_numbers = #tpu.dot_dimension_numbers<[1], [0], [0], [1], [0, 0, 1, 1], [], []>} : vector<16x128xf32>, vector<128x128xf32>, vector<16x128xf32> -> vector<16x128xf32>
    %20 = vector.broadcast %1 : vector<1x128xf32> to vector<16x128xf32>
    %21 = arith.addf %19, %20 : vector<16x128xf32>
    %cst_10 = arith.constant 0.000000e+00 : f32
    %22 = vector.broadcast %cst_10 : f32 to vector<16x128xf32>
    %23 = arith.maximumf %21, %22 : vector<16x128xf32>
    %24 = vector.shape_cast %23 : vector<16x128xf32> to vector<2x8x128xf32>
    %cst_11 = arith.constant dense<0.000000e+00> : vector<2x128xf32>
    %25 = vector.multi_reduction <add>, %24, %cst_11 [1] : vector<2x8x128xf32> to vector<2x128xf32>
    %cst_12 = arith.constant 8.000000e+00 : f32
    %26 = vector.broadcast %cst_12 : f32 to vector<2x128xf32>
    %27 = arith.divf %25, %26 : vector<2x128xf32>
    %28 = vector.broadcast %2 : vector<1x128xf32> to vector<2x128xf32>
    %29 = arith.mulf %27, %28 : vector<2x128xf32>
    %30 = vector.broadcast %3 : vector<1x128xf32> to vector<2x128xf32>
    %31 = arith.addf %29, %30 : vector<2x128xf32>
    %c0_13 = arith.constant 0 : index
    %c0_14 = arith.constant 0 : index
    %32 = vector.load %arg3[%c0_13, %c0_14] : memref<128x128xf32, #tpu.memory_space<vmem>>, vector<128x128xf32>
    %cst_15 = arith.constant dense<0.000000e+00> : vector<2x128xf32>
    %33 = tpu.matmul %31, %32, %cst_15 {dimension_numbers = #tpu.dot_dimension_numbers<[1], [0], [0], [1], [0, 0, 1, 1], [], []>} : vector<2x128xf32>, vector<128x128xf32>, vector<2x128xf32> -> vector<2x128xf32>
    %34 = vector.broadcast %4 : vector<1x128xf32> to vector<2x128xf32>
    %35 = arith.addf %33, %34 : vector<2x128xf32>
    %c0_16 = arith.constant 0 : index
    %c0_17 = arith.constant 0 : index
    %36 = vector.load %arg5[%c0_16, %c0_17] : memref<38x128xf32, #tpu.memory_space<vmem>>, vector<16x128xf32>
    tpu.vector_store %arg5[%c0_16, %c0_17], %17 {strides = array<i32>} : memref<38x128xf32, #tpu.memory_space<vmem>>, vector<16x128xf32>,
    %c16 = arith.constant 16 : index
    %c0_18 = arith.constant 0 : index
    %37 = vector.load %arg5[%c16, %c0_18] : memref<38x128xf32, #tpu.memory_space<vmem>>, vector<16x128xf32>
    tpu.vector_store %arg5[%c16, %c0_18], %23 {strides = array<i32>} : memref<38x128xf32, #tpu.memory_space<vmem>>, vector<16x128xf32>,
    %c32 = arith.constant 32 : index
    %c0_19 = arith.constant 0 : index
    %38 = vector.load %arg5[%c32, %c0_19] : memref<38x128xf32, #tpu.memory_space<vmem>>, vector<2x128xf32>
    tpu.vector_store %arg5[%c32, %c0_19], %27 {strides = array<i32>} : memref<38x128xf32, #tpu.memory_space<vmem>>, vector<2x128xf32>,
    %c34 = arith.constant 34 : index
    %c0_20 = arith.constant 0 : index
    %39 = vector.load %arg5[%c34, %c0_20] : memref<38x128xf32, #tpu.memory_space<vmem>>, vector<2x128xf32>
    tpu.vector_store %arg5[%c34, %c0_20], %31 {strides = array<i32>} : memref<38x128xf32, #tpu.memory_space<vmem>>, vector<2x128xf32>,
    %c36 = arith.constant 36 : index
    %c0_21 = arith.constant 0 : index
    %40 = vector.load %arg5[%c36, %c0_21] : memref<38x128xf32, #tpu.memory_space<vmem>>, vector<2x128xf32>
    tpu.vector_store %arg5[%c36, %c0_21], %35 {strides = array<i32>} : memref<38x128xf32, #tpu.memory_space<vmem>>, vector<2x128xf32>,
    return
  }
}

</mosaic_0001>

<bundles_post_ra>
// kernel: textcnn_forward.1
= control target key start
LH: loop header
LB: loop body
LE: loop exit
PB: predicated region body
PF: predicated region fallthrough
CT: control target
= control target key end

     0   :  { %v27_v0 = vlaneseq  ;;  %v915_v1 = vmov 0   ;;  %v916_v2 = vmov 1966171168   ;;  %v917_v6 = vmov 0.0   ;;  %s1360_s0 = inlined_call_operand.vmem [shape: s32[16,1], index: 0, kind: input, shape index: {}]   ;;  %s1361_s2 = inlined_call_operand.vmem [shape: f32[128,128], index: 2, kind: input, shape index: {}]   ;;  %s1362_s3 = inlined_call_operand.vmem [shape: f32[128,128], index: 3, kind: input, shape index: {}]   ;;  %s1363_s1 = inlined_call_operand.vmem [shape: f32[22,128], index: 1, kind: input, shape index: {}]   ;;  %s1364_s5 = inlined_call_operand.vmem [shape: f32[38,128], index: 5, kind: output, shape index: {}]   ;;  %s1365_s4 = inlined_call_operand.vmem [shape: f32[8,128], index: 4, kind: input, shape index: {}]  }
   0x1   :  { %912 = vset.pattern.permute.xlu1 %v915_v1  ;;  %911 = vset.pattern.permute.xlu0 %v915_v1  ;;  %v25_v3 = vunpack.c.l.s4 %v916_v2  ;;  %v21_v5 = vld [vmem:[%s1360_s0] sm:$0xff]  ;;  %v22_v9 = vld [vmem:[%s1360_s0 + $0x8] sm:$0xff]  ;;  %v544_v53 = vld [vmem:[%s1361_s2 + $0x78] sm:$0xff]  ;;  %vm385_vm0 = vcmask 1045504  }
   0x2   :  { %v949_v4 = vshrl.u32 %v27_v0, 7  ;;  %872 = vmatprep.subr.mxu1 %v917_v6  ;;  %v23_v8 = vcombine.high %v21_v5, %v21_v5  ;;  %v72_v28 = vcombine.high %v22_v9, %v22_v9  ;;  %837 = vmatprep.subr.mxu0 %v544_v53  ;;  %v543_v54 = vld [vmem:[%s1361_s2 + $0x70] sm:$0xff]  ;;  %v542_v55 = vld [vmem:[%s1361_s2 + $0x68] sm:$0xff]  ;;  %v541_v56 = vld [vmem:[%s1361_s2 + $0x60] sm:$0xff] }
   0x3   :  { %v26_v7 = vunpack.c.0.s8 %v25_v3  ;;  %838 = vmatpush3.msra.mxu0 %v544_v53  ;;  %v540_v57 = vld [vmem:[%s1361_s2 + $0x58] sm:$0xff]  ;;  %v539_v58 = vld [vmem:[%s1361_s2 + $0x50] sm:$0xff]  ;;  %v538_v59 = vld [vmem:[%s1361_s2 + $0x48] sm:$0xff] }
   0x4   :  { %v960_v12 = vsub.s32 0, %v949_v4  ;;  %839 = vmatprep.subr.mxu0 %v543_v54  ;;  %v537_v60 = vld [vmem:[%s1361_s2 + $0x40] sm:$0xff]  ;;  %v536_v61 = vld [vmem:[%s1361_s2 + $0x38] sm:$0xff]  ;;  %v535_v62 = vld [vmem:[%s1361_s2 + $0x30] sm:$0xff] }
   0x5   :  { %v29_v10 = vsub.s32 %v26_v7, %v949_v4  ;;  %840 = vmatpush3.msra.mxu0 %v543_v54  ;;  %v534_v63 = vld [vmem:[%s1361_s2 + $0x28] sm:$0xff]  ;;  %v533_v0 = vld [vmem:[%s1361_s2 + $0x20] sm:$0xff]  ;;  %v532_v1 = vld [vmem:[%s1361_s2 + $0x18] sm:$0xff] }
   0x6   :  { %841 = vmatprep.subr.mxu0 %v542_v55  ;;  %v531_v2 = vld [vmem:[%s1361_s2 + $0x10] sm:$0xff]  ;;  %v530_v3 = vld [vmem:[%s1361_s2 + $0x8] sm:$0xff]  ;;  %v707_v7 = vld [vmem:[%s1362_s3 + $0x78] sm:$0xff] }
   0x7   :  { %v79_v11 = vrot.slane %v22_v9, %v29_v10  ;;  %v30_v13 = vrot.slane %v21_v5, %v29_v10  ;;  %v37_v14 = vrot.slane %v23_v8, %v29_v10  ;;  %v86_v34 = vrot.slane %v72_v28, %v29_v10  ;;  %842 = vmatpush3.msra.mxu0 %v542_v55  ;;  %v529_v5 = vld [vmem:[%s1361_s2] sm:$0xff]  ;;  %v706_v8 = vld [vmem:[%s1362_s3 + $0x70] sm:$0xff]  ;;  %v705_v9 = vld [vmem:[%s1362_s3 + $0x68] sm:$0xff] }
   0x8   :  { %843 = vmatprep.subr.mxu0 %v541_v56  ;;  %873 = vmatpush3.msra.mxu1 %v707_v7 }
   0x9   :  { %v95_v15 = vrot.slane %v79_v11, %v29_v10  ;;  %v87_v16 = vcombine.high %v79_v11, %v79_v11  ;;  %v46_v17 = vrot.slane %v30_v13, %v29_v10  ;;  %v38_v18 = vcombine.high %v30_v13, %v30_v13  ;;  %844 = vmatpush3.msra.mxu0 %v541_v56  ;;  %v1047_v13 = vld [vmem:[%s1363_s1] sm:$0xff] }
   0xa   :  { %v53_v19 = vrot.slane %v37_v14, %v29_v10  ;;  %v39_v23 = vcombine.high %v37_v14, %v37_v14  ;;  %v102_v38 = vrot.slane %v86_v34, %v29_v10  ;;  %v88_v39 = vcombine.high %v86_v34, %v86_v34  ;;  %845 = vmatprep.subr.mxu0 %v540_v57  ;;  %v1052_v14 = vld [vmem:[%s1363_s1 + $0x8] sm:$0xff] }
   0xb   :  { %v160_v20 = vrot.slane %v95_v15, %v960_v12  ;;  %v128_v21 = vrot.slane %v46_v17, %v960_v12  ;;  %v60_v22 = vrot.slane %v38_v18, %v29_v10  ;;  %v68_v24 = vcombine.high %v46_v17, %v46_v17  ;;  %846 = vmatpush3.msra.mxu0 %v540_v57 }
   0xc   :  { %v144_v25 = vrot.slane %v53_v19, %v960_v12  ;;  %v109_v26 = vrot.slane %v87_v16, %v29_v10  ;;  %v117_v29 = vcombine.high %v95_v15, %v95_v15  ;;  %v67_v32 = vrot.slane %v39_v23, %v29_v10  ;;  %847 = vmatprep.subr.mxu0 %v539_v58  ;;  %v1057_v15 = vld [vmem:[%s1363_s1 + $0x10] sm:$0x3f] }
   0xd   :  { %214 = vperm.xlu1 %912, %v160_v20   ;;  %190 = vperm.xlu0 %911, %v128_v21   ;;  %v132_v27 = vrot.slane %v60_v22, %v960_v12  ;;  %v136_v31 = vrot.slane %v68_v24, %v960_v12  ;;  %v70_v37 = vcombine.high %v60_v22, %v60_v22  ;;  %v1042_v11 = vadd.s32 16, %v949_v4 }
   0xe   :  { %v164_v30 = vrot.slane %v109_v26, %v960_v12  ;;  %v168_v33 = vrot.slane %v117_v29, %v960_v12  ;;  %v148_v35 = vrot.slane %v67_v32, %v960_v12  ;;  %v119_v36 = vcombine.high %v109_v26, %v109_v26  ;;  %848 = vmatpush3.msra.mxu0 %v539_v58 }
   0xf   :  { %v140_v41 = vrot.slane %v70_v37, %v960_v12  ;;  %v69_v42 = vcombine.high %v53_v19, %v53_v19  ;;  %v176_v43 = vrot.slane %v102_v38, %v960_v12  ;;  %v116_v45 = vrot.slane %v88_v39, %v29_v10  ;;  %849 = vmatprep.subr.mxu0 %v538_v59 }
  0x10   :  { %v172_v40 = vrot.slane %v119_v36, %v960_v12  ;;  %v71_v46 = vcombine.high %v67_v32, %v67_v32  ;;  %v118_v47 = vcombine.high %v102_v38, %v102_v38  ;;  %850 = vmatpush3.msra.mxu0 %v538_v59  ;;  %874 = vmatprep.subr.mxu1 %v917_v6  ;;  %v1039_v10 = vadd.s32 8, %v949_v4 }
  0x11   :  { %193 = vperm.xlu0 %911, %v132_v27   ;;  %202 = vperm.xlu1 %912, %v144_v25   ;;  %v152_v44 = vrot.slane %v69_v42, %v960_v12  ;;  %v180_v48 = vrot.slane %v116_v45, %v960_v12  ;;  %v120_v50 = vcombine.high %v116_v45, %v116_v45 }
  0x12   :  { %v156_v49 = vrot.slane %v71_v46, %v960_v12  ;;  %v184_v51 = vrot.slane %v118_v47, %v960_v12  ;;  %851 = vmatprep.subr.mxu0 %v537_v60  ;;  %875 = vmatpush3.msra.mxu1 %v706_v8 }
  0x13   :  { %v188_v52 = vrot.slane %v120_v50, %v960_v12  ;;  %852 = vmatpush3.msra.mxu0 %v537_v60  ;;  %876 = vmatprep.subr.mxu1 %v917_v6 }
  0x14   :  { %853 = vmatprep.subr.mxu0 %v536_v61  ;;  %877 = vmatpush3.msra.mxu1 %v705_v9 }
  0x15   :  { %217 = vperm.xlu0 %911, %v164_v30   ;;  %196 = vperm.xlu1 %912, %v136_v31  }
  0x16   :  { %854 = vmatpush3.msra.mxu0 %v536_v61  ;;  %878 = vmatprep.subr.mxu1 %v917_v6 }
  0x17   :  { %855 = vmatprep.subr.mxu0 %v535_v62 }
  0x18   :  { %856 = vmatpush3.msra.mxu0 %v535_v62 }
  0x19   :  { %220 = vperm.xlu0 %911, %v168_v33   ;;  %205 = vperm.xlu1 %912, %v148_v35  }
  0x1a   :  { %857 = vmatprep.subr.mxu0 %v534_v63 }
  0x1b   :  { %858 = vmatpush3.msra.mxu0 %v534_v63 }
  0x1c   :  { %859 = vmatprep.subr.mxu0 %v533_v0 }
  0x1d   :  { %223 = vperm.xlu0 %911, %v172_v40   ;;  %199 = vperm.xlu1 %912, %v140_v41  }
  0x1e   :  { %860 = vmatpush3.msra.mxu0 %v533_v0 }
  0x1f   :  { %861 = vmatprep.subr.mxu0 %v532_v1 }
  0x20   :  { %862 = vmatpush3.msra.mxu0 %v532_v1 }
  0x21   :  { %226 = vperm.xlu0 %911, %v176_v43   ;;  %208 = vperm.xlu1 %912, %v152_v44  }
  0x22   :  { %863 = vmatprep.subr.mxu0 %v531_v2 }
  0x23   :  { %864 = vmatpush3.msra.mxu0 %v531_v2 }
  0x24   :  { %865 = vmatprep.subr.mxu0 %v530_v3 }
  0x25   :  { %229 = vperm.xlu0 %911, %v180_v48   ;;  %211 = vperm.xlu1 %912, %v156_v49  }
  0x26   :  { %866 = vmatpush3.msra.mxu0 %v530_v3 }
  0x27   :  { %867 = vmatprep.subr.mxu0 %v529_v5 }
  0x28   :  { %868 = vmatpush3.msra.mxu0 %v529_v5 }
  0x29   :  { %232 = vperm.xlu0 %911, %v184_v51   ;;  %235 = vperm.xlu1 %912, %v188_v52  }
  0x88   :  { %v215_v16 = vpop.permute.xlu1 %214  ;;  %v191_v17 = vpop.permute.xlu0 %190 }
  0x89   :  { %vm261_vm1 = vcmp.eq.s32.totalorder %v949_v4, %v215_v16  ;;  %vm262_vm2 = vcmp.eq.s32.totalorder %v1039_v10, %v215_v16  ;;  %vm263_vm3 = vcmp.eq.s32.totalorder %v1042_v11, %v215_v16  ;;  %vm237_vm4 = vcmp.eq.s32.totalorder %v949_v4, %v191_v17 }
  0x8a   :  { %v309_v18 = vsel %vm261_vm1, 1.0, %v917_v6  ;;  %v310_v19 = vsel %vm262_vm2, 1.0, %v917_v6  ;;  %v311_v20 = vsel %vm263_vm3, 1.0, %v917_v6  ;;  %vm238_vm5 = vcmp.eq.s32.totalorder %v1039_v10, %v191_v17 }
  0x8b   :  { %v360_v21 = vmul.f32 %v1047_v13, %v309_v18  ;;  %v361_v22 = vmul.f32 %v1052_v14, %v310_v19  ;;  %v362_v23 = vmul.f32 %v1057_v15, %v311_v20  ;;  %vm239_vm6 = vcmp.eq.s32.totalorder %v1042_v11, %v191_v17 }
  0x8c   :  { %v285_v24 = vsel %vm237_vm4, 1.0, %v917_v6  ;;  %v286_v25 = vsel %vm238_vm5, 1.0, %v917_v6  ;;  %v287_v26 = vsel %vm239_vm6, 1.0, %v917_v6  ;;  %v194_v27 = vpop.permute.xlu0 %193  ;;  %v203_v33 = vpop.permute.xlu1 %202 }
  0x8d   :  { %v457_v28 = vadd.f32 %v361_v22, %v360_v21  ;;  %v458_v29 = vsel %vm385_vm0, %v362_v23, 0.0  ;;  %v336_v30 = vmul.f32 %v1047_v13, %v285_v24  ;;  %v337_v31 = vmul.f32 %v1052_v14, %v286_v25 }
  0x8e   :  { %v338_v32 = vmul.f32 %v1057_v15, %v287_v26  ;;  %vm240_vm7 = vcmp.eq.s32.totalorder %v949_v4, %v194_v27  ;;  %vm241_vm8 = vcmp.eq.s32.totalorder %v1039_v10, %v194_v27  ;;  %vm242_vm9 = vcmp.eq.s32.totalorder %v1042_v11, %v194_v27 }
  0x8f   :  { %v459_v34 = vadd.f32 %v458_v29, %v457_v28  ;;  %v384_v35 = vadd.f32 %v337_v31, %v336_v30  ;;  %v288_v36 = vsel %vm240_vm7, 1.0, %v917_v6  ;;  %v289_v37 = vsel %vm241_vm8, 1.0, %v917_v6 }
  0x90   :  { %v386_v38 = vsel %vm385_vm0, %v338_v32, 0.0  ;;  %v290_v39 = vsel %vm242_vm9, 1.0, %v917_v6  ;;  %v339_v40 = vmul.f32 %v1047_v13, %v288_v36  ;;  %v340_v41 = vmul.f32 %v1052_v14, %v289_v37  ;;  %v218_v47 = vpop.permute.xlu0 %217  ;;  %v197_v1 = vpop.permute.xlu1 %196 }
  0x91   :  { %v460_v42 = vrot.slane %v459_v34, 4  ;;  %v387_v43 = vadd.f32 %v386_v38, %v384_v35  ;;  %v341_v44 = vmul.f32 %v1057_v15, %v290_v39  ;;  %vm249_vm10 = vcmp.eq.s32.totalorder %v949_v4, %v203_v33 }
  0x92   :  { %v394_v45 = vadd.f32 %v340_v41, %v339_v40  ;;  %vm250_vm11 = vcmp.eq.s32.totalorder %v1039_v10, %v203_v33  ;;  %vm251_vm12 = vcmp.eq.s32.totalorder %v1042_v11, %v203_v33  ;;  %v297_v46 = vsel %vm249_vm10, 1.0, %v917_v6 }
  0x93   :  { %v461_v48 = vadd.f32 %v460_v42, %v459_v34  ;;  %v388_v49 = vrot.slane %v387_v43, 4  ;;  %v395_v50 = vsel %vm385_vm0, %v341_v44, 0.0  ;;  %v298_v51 = vsel %vm250_vm11, 1.0, %v917_v6 }
  0x94   :  { %v396_v52 = vadd.f32 %v395_v50, %v394_v45  ;;  %v299_v53 = vsel %vm251_vm12, 1.0, %v917_v6  ;;  %v348_v54 = vmul.f32 %v1047_v13, %v297_v46  ;;  %v349_v55 = vmul.f32 %v1052_v14, %v298_v51  ;;  %v221_v25 = vpop.permute.xlu0 %220  ;;  %v206_v36 = vpop.permute.xlu1 %205 }
  0x95   :  { %v462_v56 = vrot.slane %v461_v48, 2  ;;  %v389_v57 = vadd.f32 %v388_v49, %v387_v43  ;;  %v350_v58 = vmul.f32 %v1057_v15, %v299_v53  ;;  %vm264_vm13 = vcmp.eq.s32.totalorder %v949_v4, %v218_v47 }
  0x96   :  { %v397_v59 = vrot.slane %v396_v52, 4  ;;  %v421_v60 = vadd.f32 %v349_v55, %v348_v54  ;;  %vm265_vm14 = vcmp.eq.s32.totalorder %v1039_v10, %v218_v47  ;;  %vm266_vm15 = vcmp.eq.s32.totalorder %v1042_v11, %v218_v47 }
  0x97   :  { %v463_v61 = vadd.f32 %v462_v56, %v461_v48  ;;  %v390_v62 = vrot.slane %v389_v57, 2  ;;  %v422_v63 = vsel %vm385_vm0, %v350_v58, 0.0  ;;  %v312_v0 = vsel %vm264_vm13, 1.0, %v917_v6 }
  0x98   :  { %v398_v2 = vadd.f32 %v397_v59, %v396_v52  ;;  %v423_v3 = vadd.f32 %v422_v63, %v421_v60  ;;  %v313_v5 = vsel %vm265_vm14, 1.0, %v917_v6  ;;  %v314_v7 = vsel %vm266_vm15, 1.0, %v917_v6  ;;  %v224_v46 = vpop.permute.xlu0 %223 }
  0x99   :  { %v464_v8 = vrot.slane %v463_v61, 1  ;;  %v391_v9 = vadd.f32 %v390_v62, %v389_v57  ;;  %v363_v16 = vmul.f32 %v1047_v13, %v312_v0  ;;  %v364_v17 = vmul.f32 %v1052_v14, %v313_v5 }
  0x9a   :  { %v399_v18 = vrot.slane %v398_v2, 2  ;;  %v424_v19 = vrot.slane %v423_v3, 4  ;;  %v365_v20 = vmul.f32 %v1057_v15, %v314_v7  ;;  %vm243_vm1 = vcmp.eq.s32.totalorder %v949_v4, %v197_v1 }
  0x9b   :  { %v466_v21 = vadd.f32 %v364_v17, %v363_v16  ;;  %vm244_vm2 = vcmp.eq.s32.totalorder %v1039_v10, %v197_v1  ;;  %v392_v22 = vrot.slane %v391_v9, 1  ;;  %vm245_vm3 = vcmp.eq.s32.totalorder %v1042_v11, %v197_v1 }
  0x9c   :  { %v400_v23 = vadd.f32 %v399_v18, %v398_v2  ;;  %v467_v24 = vsel %vm385_vm0, %v365_v20, 0.0  ;;  %v291_v27 = vsel %vm243_vm1, 1.0, %v917_v6  ;;  %v292_v28 = vsel %vm244_vm2, 1.0, %v917_v6 }
  0x9d   :  { %v468_v26 = vadd.f32 %v467_v24, %v466_v21  ;;  %v1114_v29 = vadd.f32 %v464_v8, %v463_v61  ;;  %v1116_v30 = vadd.f32 %v424_v19, %v423_v3  ;;  %v293_v31 = vsel %vm245_vm3, 1.0, %v917_v6  ;;  %v200_v8 = vpop.permute.xlu1 %199 }
  0x9e   :  { %v342_v32 = vmul.f32 %v1047_v13, %v291_v27  ;;  %v343_v34 = vmul.f32 %v1052_v14, %v292_v28  ;;  %v344_v35 = vmul.f32 %v1057_v15, %v293_v31  ;;  %vm267_vm4 = vcmp.eq.s32.totalorder %v949_v4, %v221_v25  ;;  %v227_v28 = vpop.permute.xlu0 %226 }
  0x9f   :  { %v469_v33 = vrot.slane %v468_v26, 4  ;;  %v1123_v37 = vadd.f32 %v392_v22, %v391_v9  ;;  %v401_v38 = vrot.slane %v400_v23, 1  ;;  %vm268_vm5 = vcmp.eq.s32.totalorder %v1039_v10, %v221_v25 }
  0xa0   :  { %vm269_vm6 = vcmp.eq.s32.totalorder %v1042_v11, %v221_v25  ;;  %v403_v40 = vadd.f32 %v343_v34, %v342_v32  ;;  %v404_v41 = vsel %vm385_vm0, %v344_v35, 0.0  ;;  %v315_v42 = vsel %vm267_vm4, 1.0, %v917_v6 }
  0xa1   :  { %v470_v39 = vadd.f32 %v469_v33, %v468_v26  ;;  %v316_v43 = vsel %vm268_vm5, 1.0, %v917_v6  ;;  %v317_v44 = vsel %vm269_vm6, 1.0, %v917_v6  ;;  %v366_v45 = vmul.f32 %v1047_v13, %v315_v42 }
  0xa2   :  { %vm252_vm7 = vcmp.eq.s32.totalorder %v949_v4, %v206_v36  ;;  %v426_v47 = vrot.slane %v1116_v30, 2  ;;  %v405_v48 = vadd.f32 %v404_v41, %v403_v40  ;;  %v367_v49 = vmul.f32 %v1052_v14, %v316_v43 }
  0xa3   :  { %v368_v50 = vmul.f32 %v1057_v15, %v317_v44  ;;  %v471_v51 = vrot.slane %v470_v39, 2  ;;  %vm253_vm8 = vcmp.eq.s32.totalorder %v1039_v10, %v206_v36  ;;  %vm254_vm9 = vcmp.eq.s32.totalorder %v1042_v11, %v206_v36 }
  0xa4   :  { %v300_v52 = vsel %vm252_vm7, 1.0, %v917_v6  ;;  %v406_v53 = vrot.slane %v405_v48, 4  ;;  %v475_v54 = vadd.f32 %v367_v49, %v366_v45  ;;  %vm270_vm10 = vcmp.eq.s32.totalorder %v949_v4, %v224_v46 }
  0xa5   :  { %v476_v55 = vsel %vm385_vm0, %v368_v50, 0.0  ;;  %v301_v56 = vsel %vm253_vm8, 1.0, %v917_v6  ;;  %v302_v57 = vsel %vm254_vm9, 1.0, %v917_v6  ;;  %v351_v58 = vmul.f32 %v1047_v13, %v300_v52 }
  0xa6   :  { %vm271_vm11 = vcmp.eq.s32.totalorder %v1039_v10, %v224_v46  ;;  %v1145_v59 = vadd.f32 %v401_v38, %v400_v23  ;;  %v407_v60 = vadd.f32 %v406_v53, %v405_v48  ;;  %v477_v61 = vadd.f32 %v476_v55, %v475_v54  ;;  %v209_v48 = vpop.permute.xlu1 %208  ;;  %v230_v53 = vpop.permute.xlu0 %229 }
  0xa7   :  { %v352_v62 = vmul.f32 %v1052_v14, %v301_v56  ;;  %v353_v63 = vmul.f32 %v1057_v15, %v302_v57  ;;  %vm272_vm12 = vcmp.eq.s32.totalorder %v1042_v11, %v224_v46  ;;  %v318_v0 = vsel %vm270_vm10, 1.0, %v917_v6 }
  0xa8   :  { %v319_v1 = vsel %vm271_vm11, 1.0, %v917_v6  ;;  %v472_v2 = vadd.f32 %v471_v51, %v470_v39  ;;  %v408_v3 = vrot.slane %v407_v60, 2  ;;  %v478_v5 = vrot.slane %v477_v61, 4 }
  0xa9   :  { %v430_v7 = vadd.f32 %v352_v62, %v351_v58  ;;  %v431_v9 = vsel %vm385_vm0, %v353_v63, 0.0  ;;  %v320_v16 = vsel %vm272_vm12, 1.0, %v917_v6  ;;  %v369_v17 = vmul.f32 %v1047_v13, %v318_v0 }
  0xaa   :  { %v370_v18 = vmul.f32 %v1052_v14, %v319_v1  ;;  %v409_v19 = vadd.f32 %v408_v3, %v407_v60  ;;  %v479_v20 = vadd.f32 %v478_v5, %v477_v61  ;;  %v371_v22 = vmul.f32 %v1057_v15, %v320_v16 }
  0xab   :  { %v432_v21 = vadd.f32 %v431_v9, %v430_v7  ;;  %vm246_vm13 = vcmp.eq.s32.totalorder %v949_v4, %v200_v8  ;;  %vm247_vm14 = vcmp.eq.s32.totalorder %v1039_v10, %v200_v8  ;;  %vm248_vm15 = vcmp.eq.s32.totalorder %v1042_v11, %v200_v8 }
  0xac   :  { %v484_v23 = vadd.f32 %v370_v18, %v369_v17  ;;  %v473_v24 = vrot.slane %v472_v2, 1  ;;  %v410_v25 = vrot.slane %v409_v19, 1  ;;  %v480_v26 = vrot.slane %v479_v20, 2 }
  0xad   :  { %v485_v27 = vsel %vm385_vm0, %v371_v22, 0.0  ;;  %v294_v32 = vsel %vm246_vm13, 1.0, %v917_v6  ;;  %v295_v33 = vsel %vm247_vm14, 1.0, %v917_v6  ;;  %v296_v34 = vsel %vm248_vm15, 1.0, %v917_v6 }
  0xae   :  { %v486_v31 = vadd.f32 %v485_v27, %v484_v23  ;;  %v1165_v35 = vadd.f32 %v426_v47, %v1116_v30  ;;  %v1167_v36 = vadd.f32 %v480_v26, %v479_v20  ;;  %v433_v38 = vrot.slane %v432_v21, 4 }
  0xaf   :  { %v345_v39 = vmul.f32 %v1047_v13, %v294_v32  ;;  %v346_v41 = vmul.f32 %v1052_v14, %v295_v33  ;;  %v347_v42 = vmul.f32 %v1057_v15, %v296_v34  ;;  %vm273_vm1 = vcmp.eq.s32.totalorder %v949_v4, %v227_v28 }
  0xb0   :  { %v487_v40 = vrot.slane %v486_v31, 4  ;;  %v1173_v43 = vadd.f32 %v473_v24, %v472_v2  ;;  %v1175_v44 = vadd.f32 %v410_v25, %v409_v19  ;;  %vm274_vm2 = vcmp.eq.s32.totalorder %v1039_v10, %v227_v28 }
  0xb1   :  { %vm275_vm3 = vcmp.eq.s32.totalorder %v1042_v11, %v227_v28  ;;  %v412_v45 = vadd.f32 %v346_v41, %v345_v39  ;;  %v413_v46 = vsel %vm385_vm0, %v347_v42, 0.0  ;;  %v321_v47 = vsel %vm273_vm1, 1.0, %v917_v6 }
  0xb2   :  { %v488_v30 = vadd.f32 %v487_v40, %v486_v31  ;;  %v1181_v49 = vadd.f32 %v433_v38, %v432_v21  ;;  %v322_v50 = vsel %vm274_vm2, 1.0, %v917_v6  ;;  %v323_v51 = vsel %vm275_vm3, 1.0, %v917_v6  ;;  %v212_v21 = vpop.permute.xlu1 %211  ;;  %v233_v40 = vpop.permute.xlu0 %232 }
  0xb3   :  { %v372_v52 = vmul.f32 %v1047_v13, %v321_v47  ;;  %v482_v54 = vrot.slane %v1167_v36, 1  ;;  %v414_v55 = vadd.f32 %v413_v46, %v412_v45  ;;  %v373_v56 = vmul.f32 %v1052_v14, %v322_v50 }
  0xb4   :  { %v374_v57 = vmul.f32 %v1057_v15, %v323_v51  ;;  %v489_v58 = vrot.slane %v488_v30, 2  ;;  %vm255_vm4 = vcmp.eq.s32.totalorder %v949_v4, %v209_v48  ;;  %vm256_vm5 = vcmp.eq.s32.totalorder %v1039_v10, %v209_v48 }
  0xb5   :  { %vm257_vm6 = vcmp.eq.s32.totalorder %v1042_v11, %v209_v48  ;;  %v415_v60 = vrot.slane %v414_v55, 4  ;;  %v493_v61 = vadd.f32 %v373_v56, %v372_v52  ;;  %vm276_vm7 = vcmp.eq.s32.totalorder %v949_v4, %v230_v53 }
  0xb6   :  { %v494_v62 = vsel %vm385_vm0, %v374_v57, 0.0  ;;  %v303_v63 = vsel %vm255_vm4, 1.0, %v917_v6  ;;  %v304_v0 = vsel %vm256_vm5, 1.0, %v917_v6  ;;  %v305_v1 = vsel %vm257_vm6, 1.0, %v917_v6  ;;  %v236_v57 = vpop.permute.xlu1 %235 }
  0xb7   :  { %vm277_vm8 = vcmp.eq.s32.totalorder %v1039_v10, %v230_v53  ;;  %v435_v2 = vrot.slane %v1181_v49, 2  ;;  %v416_v3 = vadd.f32 %v415_v60, %v414_v55  ;;  %v495_v5 = vadd.f32 %v494_v62, %v493_v61 }
  0xb8   :  { %v354_v7 = vmul.f32 %v1047_v13, %v303_v63  ;;  %v355_v8 = vmul.f32 %v1052_v14, %v304_v0  ;;  %v356_v9 = vmul.f32 %v1057_v15, %v305_v1  ;;  %vm278_vm9 = vcmp.eq.s32.totalorder %v1042_v11, %v230_v53 }
  0xb9   :  { %v324_v16 = vsel %vm276_vm7, 1.0, %v917_v6  ;;  %v1204_v17 = vadd.f32 %v489_v58, %v488_v30  ;;  %v417_v18 = vrot.slane %v416_v3, 2  ;;  %v496_v19 = vrot.slane %v495_v5, 4 }
  0xba   :  { %v325_v20 = vsel %vm277_vm8, 1.0, %v917_v6  ;;  %v439_v22 = vadd.f32 %v355_v8, %v354_v7  ;;  %v440_v23 = vsel %vm385_vm0, %v356_v9, 0.0  ;;  %v326_v24 = vsel %vm278_vm9, 1.0, %v917_v6 }
  0xbb   :  { %v375_v25 = vmul.f32 %v1047_v13, %v324_v16  ;;  %v418_v26 = vadd.f32 %v417_v18, %v416_v3  ;;  %v497_v27 = vadd.f32 %v496_v19, %v495_v5  ;;  %v376_v28 = vmul.f32 %v1052_v14, %v325_v20 }
  0xbc   :  { %v377_v31 = vmul.f32 %v1057_v15, %v326_v24  ;;  %v441_v32 = vadd.f32 %v440_v23, %v439_v22  ;;  %vm258_vm10 = vcmp.eq.s32.totalorder %v949_v4, %v212_v21  ;;  %vm259_vm11 = vcmp.eq.s32.totalorder %v1039_v10, %v212_v21 }
  0xbd   :  { %vm260_vm12 = vcmp.eq.s32.totalorder %v1042_v11, %v212_v21  ;;  %v491_v33 = vrot.slane %v1204_v17, 1  ;;  %v498_v34 = vrot.slane %v497_v27, 2  ;;  %v502_v38 = vadd.f32 %v376_v28, %v375_v25 }
  0xbe   :  { %v503_v39 = vsel %vm385_vm0, %v377_v31, 0.0  ;;  %v442_v41 = vrot.slane %v441_v32, 4  ;;  %v306_v42 = vsel %vm258_vm10, 1.0, %v917_v6  ;;  %v307_v30 = vsel %vm259_vm11, 1.0, %v917_v6 }
  0xbf   :  { %v308_v45 = vsel %vm260_vm12, 1.0, %v917_v6  ;;  %v419_v46 = vrot.slane %v418_v26, 1  ;;  %v504_v47 = vadd.f32 %v503_v39, %v502_v38  ;;  %v357_v48 = vmul.f32 %v1047_v13, %v306_v42 }
  0xc0   :  { %v358_v50 = vmul.f32 %v1052_v14, %v307_v30  ;;  %vm565_vm13 = vcmask 1041409   ;;  %v1222_v51 = vadd.f32 %v498_v34, %v497_v27  ;;  %v359_v52 = vmul.f32 %v1057_v15, %v308_v45 }
  0xc1   :  { %vm279_vm14 = vcmp.eq.s32.totalorder %v949_v4, %v233_v40  ;;  %vm280_vm15 = vcmp.eq.s32.totalorder %v1039_v10, %v233_v40  ;;  %vm567_vm1 = vcmask 1042434   ;;  %v443_v53 = vadd.f32 %v442_v41, %v441_v32 }
  0xc2   :  { %v505_v55 = vrot.slane %v504_v47, 4  ;;  %v448_v56 = vadd.f32 %v358_v50, %v357_v48  ;;  %vm281_vm2 = vcmp.eq.s32.totalorder %v1042_v11, %v233_v40  ;;  %vm569_vm3 = vcmask 1043459  }
  0xc3   :  { %v449_v58 = vsel %vm385_vm0, %v359_v52, 0.0  ;;  %v327_v60 = vsel %vm279_vm14, 1.0, %v917_v6  ;;  %v328_v61 = vsel %vm280_vm15, 1.0, %v917_v6  ;;  %v329_v62 = vsel %vm281_vm2, 1.0, %v917_v6 }
  0xc4   :  { %vm571_vm4 = vcmask 1044484   ;;  %v506_v63 = vadd.f32 %v505_v55, %v504_v47  ;;  %v450_v0 = vadd.f32 %v449_v58, %v448_v56  ;;  %v378_v1 = vmul.f32 %v1047_v13, %v327_v60 }
  0xc5   :  { %v379_v3 = vmul.f32 %v1052_v14, %v328_v61  ;;  %v380_v5 = vmul.f32 %v1057_v15, %v329_v62  ;;  %vm282_vm5 = vcmp.eq.s32.totalorder %v949_v4, %v236_v57  ;;  %vm283_vm6 = vcmp.eq.s32.totalorder %v1039_v10, %v236_v57 }
  0xc6   :  { %vm284_vm7 = vcmp.eq.s32.totalorder %v1042_v11, %v236_v57  ;;  %vm573_vm8 = vcmask 1045509   ;;  %v507_v7 = vrot.slane %v506_v63, 2  ;;  %v451_v8 = vrot.slane %v450_v0, 4 }
  0xc7   :  { %v511_v9 = vadd.f32 %v379_v3, %v378_v1  ;;  %v330_v16 = vsel %vm282_vm5, 1.0, %v917_v6  ;;  %v512_v18 = vsel %vm385_vm0, %v380_v5, 0.0  ;;  %v331_v19 = vsel %vm283_vm6, 1.0, %v917_v6 }
  0xc8   :  { %v332_v20 = vsel %vm284_vm7, 1.0, %v917_v6  ;;  %v381_v21 = vmul.f32 %v1047_v13, %v330_v16  ;;  %v508_v22 = vadd.f32 %v507_v7, %v506_v63  ;;  %v382_v10 = vmul.f32 %v1052_v14, %v331_v19  ;;  %v702_v16 = vld [vmem:[%s1362_s3 + $0x50] sm:$0xff]  ;;  %v700_v19 = vld [vmem:[%s1362_s3 + $0x40] sm:$0xff] }
  0xc9   :  { %v513_v23 = vadd.f32 %v512_v18, %v511_v9  ;;  %v383_v11 = vmul.f32 %v1057_v15, %v332_v20  ;;  %vm575_vm9 = vcmask 1046534   ;;  %v420_v24 = vadd.f32 %v419_v46, %v418_v26  ;;  %v703_v9 = vld [vmem:[%s1362_s3 + $0x58] sm:$0xff]  ;;  %v701_v18 = vld [vmem:[%s1362_s3 + $0x48] sm:$0xff] }
  0xca   :  { %v428_v25 = vrot.slane %v1165_v35, 1  ;;  %v436_v27 = vadd.f32 %v435_v2, %v1181_v49  ;;  %v444_v28 = vrot.slane %v443_v53, 2  ;;  %v520_v32 = vadd.f32 %v382_v10, %v381_v21  ;;  %v699_v20 = vld [vmem:[%s1362_s3 + $0x38] sm:$0xff]  ;;  %v698_v21 = vld [vmem:[%s1362_s3 + $0x30] sm:$0xff] }
  0xcb   :  { %v514_v31 = vrot.slane %v513_v23, 4  ;;  %v521_v34 = vsel %vm385_vm0, %v383_v11, 0.0  ;;  %v452_v13 = vadd.f32 %v451_v8, %v450_v0  ;;  %v566_v15 = vsel %vm565_vm13, %v1145_v59, %v1123_v37  ;;  %v704_v8 = vld [vmem:[%s1362_s3 + $0x60] sm:$0xff]  ;;  %v695_v10 = vld [vmem:[%s1362_s3 + $0x18] sm:$0xff]  ;;  %v694_v11 = vld [vmem:[%s1362_s3 + $0x10] sm:$0xff] }
  0xcc   :  { %v429_v38 = vadd.f32 %v428_v25, %v1165_v35  ;;  %v437_v39 = vrot.slane %v436_v27, 1  ;;  %v445_v14 = vadd.f32 %v444_v28, %v443_v53  ;;  %v522_v40 = vadd.f32 %v521_v34, %v520_v32  ;;  %879 = vmatpush3.msra.mxu1 %v704_v8  ;;  %v692_v25 = vld [vmem:[%s1362_s3] sm:$0xff] }
  0xcd   :  { %v515_v26 = vadd.f32 %v514_v31, %v513_v23  ;;  %v453_v41 = vrot.slane %v452_v13, 2  ;;  %v568_v49 = vsel %vm567_vm1, %v1175_v44, %v566_v15  ;;  %v500_v2 = vrot.slane %v1222_v51, 1  ;;  %880 = vmatprep.subr.mxu1 %v917_v6  ;;  %v696_v23 = vld [vmem:[%s1362_s3 + $0x20] sm:$0xff] }
  0xce   :  { %v438_v42 = vadd.f32 %v437_v39, %v436_v27  ;;  %v446_v30 = vrot.slane %v445_v14, 1  ;;  %v570_v45 = vsel %vm569_vm3, %v420_v24, %v568_v49  ;;  %v523_v35 = vrot.slane %v522_v40, 4  ;;  %881 = vmatpush3.msra.mxu1 %v703_v9  ;;  %v693_v24 = vld [vmem:[%s1362_s3 + $0x8] sm:$0xff]  ;;  %v20_v27 = vld [vmem:[%s1365_s4] sm:$0xff] }
  0xcf   :  { %v516_v46 = vrot.slane %v515_v26, 2  ;;  %v454_v47 = vadd.f32 %v453_v41, %v452_v13  ;;  %v572_v48 = vsel %vm571_vm4, %v429_v38, %v570_v45  ;;  %v483_v37 = vadd.f32 %v482_v54, %v1167_v36  ;;  %882 = vmatprep.subr.mxu1 %v917_v6 }
  0xd0   :  { %v492_v59 = vadd.f32 %v491_v33, %v1204_v17  ;;  %v447_v44 = vadd.f32 %v446_v30, %v445_v14  ;;  %v509_v50 = vrot.slane %v508_v22, 1  ;;  %v524_v52 = vadd.f32 %v523_v35, %v522_v40  ;;  %883 = vmatpush3.msra.mxu1 %v702_v16 }
  0xd1   :  { %v455_v53 = vrot.slane %v454_v47, 1  ;;  %v574_v55 = vsel %vm573_vm8, %v438_v42, %v572_v48  ;;  %v517_v56 = vadd.f32 %v516_v46, %v515_v26  ;;  %vm577_vm0 = vcmask 1047559   ;;  %884 = vmatprep.subr.mxu1 %v917_v6 }
  0xd2   :  { %v501_v57 = vadd.f32 %v500_v2, %v1222_v51  ;;  %v579_v58 = vsel %vm565_vm13, %v1173_v43, %v1114_v29  ;;  %v510_v36 = vadd.f32 %v509_v50, %v508_v22  ;;  %v525_v61 = vrot.slane %v524_v52, 2  ;;  %885 = vmatpush3.msra.mxu1 %v701_v18  ;;  %v697_v22 = vld [vmem:[%s1362_s3 + $0x28] sm:$0xff] }
  0xd3   :  { %v456_v60 = vadd.f32 %v455_v53, %v454_v47  ;;  %v518_v54 = vrot.slane %v517_v56, 1  ;;  %v576_v17 = vsel %vm575_vm9, %v447_v44, %v574_v55  ;;  %v580_v33 = vsel %vm567_vm1, %v483_v37, %v579_v58  ;;  %886 = vmatprep.subr.mxu1 %v917_v6 }
  0xd4   :  { %v526_v0 = vadd.f32 %v525_v61, %v524_v52  ;;  %v581_v1 = vsel %vm569_vm3, %v492_v59, %v580_v33  ;;  %887 = vmatpush3.msra.mxu1 %v700_v19  ;;  %vm918_vm10 = vmmov 0   ;;  %v548_v28 = vrot.slane %v20_v27, %v960_v12 }
  0xd5   :  { %v578_v62 = vsel %vm577_vm0, %v456_v60, %v576_v17  ;;  %v519_v63 = vadd.f32 %v518_v54, %v517_v56  ;;  %v582_v29 = vsel %vm571_vm4, %v501_v57, %v581_v1  ;;  %888 = vmatprep.subr.mxu1 %v917_v6  ;;  %904 = vmatprep.mubr.msk.f32.mxu1 %vm918_vm10, %v917_v6  ;;  %v682_v49 = vsub.s32 1, %v949_v4 }
  0xd6   :  { %869 = vmatprep.mubr.f32.mxu0 %v578_v62  ;;  %787 = vst [vmem:[%s1364_s5] sm:$0xff] %v578_v62  ;;  %v527_v43 = vrot.slane %v526_v0, 1  ;;  %v583_v51 = vsel %vm573_vm8, %v510_v36, %v582_v29  ;;  %889 = vmatpush3.msra.mxu1 %v699_v20  ;;  %v688_v30 = vsub.s32 2, %v949_v4  ;;  %v710_v58 = vsub.s32 3, %v949_v4 }
  0xd7   :  { %v584_v3 = vsel %vm575_vm9, %v519_v63, %v583_v51  ;;  %890 = vmatprep.subr.mxu1 %v917_v6  ;;  %v683_v35 = vrot.slane %v20_v27, %v682_v49 }
  0xd8   :  { %v528_v5 = vadd.f32 %v527_v43, %v526_v0  ;;  %891 = vmatpush3.msra.mxu1 %v698_v21  ;;  %v689_v37 = vrot.slane %v20_v27, %v688_v30  ;;  %v711_v60 = vrot.slane %v20_v27, %v710_v58 }
  0xd9   :  { %892 = vmatprep.subr.mxu1 %v917_v6 }
  0xda   :  { %v585_v7 = vsel %vm577_vm0, %v528_v5, %v584_v3  ;;  %893 = vmatpush3.msra.mxu1 %v697_v22 }
  0xdb   :  { %870 = vmatmul.mubr.f32.vlgmr.msra.gmra.mxu0 %v585_v7  ;;  %788 = vst [vmem:[%s1364_s5 + $0x8] sm:$0xff] %v585_v7  ;;  %894 = vmatprep.subr.mxu1 %v917_v6 }
  0xdc   :  { %895 = vmatpush3.msra.mxu1 %v696_v23 }
  0xdd   :  { %896 = vmatprep.subr.mxu1 %v917_v6 }
  0xde   :  { %897 = vmatpush3.msra.mxu1 %v695_v10 }
  0xdf   :  { %898 = vmatprep.subr.mxu1 %v917_v6 }
  0xe0   :  { %899 = vmatpush3.msra.mxu1 %v694_v11 }
  0xe1   :  { %900 = vmatprep.subr.mxu1 %v917_v6 }
  0xe2   :  { %901 = vmatpush3.msra.mxu1 %v693_v24 }
  0xe3   :  { %902 = vmatprep.subr.mxu1 %v917_v6 }
  0xe4   :  { %903 = vmatpush3.msra.mxu1 %v692_v25 }
 0x19b   :  { %v871_v31 = vpop.f32.mrf.mxu0 }
 0x19c   :  { %v660_v32 = vadd.f32 %v871_v31, %v548_v28 }
 0x19d   :  { %v654_v34 = vpop.f32.mrf.mxu0 }
 0x19e   :  { %v664_v13 = vmax.f32 %v660_v32, 0.0  ;;  %v655_v38 = vadd.f32 %v654_v34, %v548_v28 }
 0x1a0   :  { %v671_v39 = vrot.slane %v664_v13, 4  ;;  %790 = vst [vmem:[%s1364_s5 + $0x18] sm:$0xff] %v664_v13  ;;  %v663_v14 = vmax.f32 %v655_v38, 0.0 }
 0x1a2   :  { %v672_v15 = vadd.f32 %v671_v39, %v664_v13  ;;  %v665_v6 = vrot.slane %v663_v14, 4  ;;  %789 = vst [vmem:[%s1364_s5 + $0x10] sm:$0xff] %v663_v14 }
 0x1a4   :  { %v673_v26 = vrot.slane %v672_v15, 2  ;;  %v666_v40 = vadd.f32 %v665_v6, %v663_v14 }
 0x1a6   :  { %v674_v12 = vadd.f32 %v673_v26, %v672_v15  ;;  %v667_v41 = vrot.slane %v666_v40, 2 }
 0x1a8   :  { %v675_v2 = vrot.slane %v674_v12, 1  ;;  %v668_v42 = vadd.f32 %v667_v41, %v666_v40 }
 0x1aa   :  { %v676_v45 = vadd.f32 %v675_v2, %v674_v12  ;;  %v669_v46 = vrot.slane %v668_v42, 1 }
 0x1ac   :  { %v679_v47 = vmul.f32 0.125, %v676_v45  ;;  %v670_v48 = vadd.f32 %v669_v46, %v668_v42 }
 0x1ae   :  { %v678_v59 = vmul.f32 0.125, %v670_v48  ;;  %v685_v44 = vmul.f32 %v683_v35, %v679_v47 }
 0x1b0   :  { %v793_v50 = vsel %vm565_vm13, %v679_v47, %v678_v59  ;;  %v684_v52 = vmul.f32 %v683_v35, %v678_v59  ;;  %v691_v53 = vadd.f32 %v689_v37, %v685_v44 }
 0x1b1   :  { %795 = vst [vmem:[%s1364_s5 + $0x20] sm:$0x3] %v793_v50 }
 0x1b2   :  { %v690_v55 = vadd.f32 %v689_v37, %v684_v52  ;;  %v714_v56 = vrot.slane %v691_v53, 7 }
 0x1b4   :  { %v715_v57 = vsel %vm565_vm13, %v714_v56, %v690_v55 }
 0x1b5   :  { %905 = vmatmul.mubr.f32.vlgmr.msra.gmra.mxu1 %v715_v57  ;;  %796 = vst [vmem:[%s1364_s5 + $0x22] sm:$0x3] %v715_v57 }
 0x275   :  { %v783_v36 = vpop.f32.mrf.mxu1 }
 0x276   :  { %v784_v54 = vadd.f32 %v783_v36, %v711_v60 }
 0x277   :  { %v906_v61 = vpop.f32.mrf.mxu1 }
 0x278   :  { %797 = vst [vmem:[%s1364_s5 + $0x24] sm:$0x3] %v784_v54 }

</bundles_post_ra>
